<compile_context>
chip_gen: v7x
topology: tpu7x:2x2x1
jax: 0.10.0
libtpu: 0.0.40
codegen_flags: <defaults>
</compile_context>

<pallas_src>
import numpy as np
import jax
import jax.numpy as jnp
from jax import lax
from jax.experimental import pallas as pl
from jax.experimental.pallas import tpu as pltpu

# ---- small, module-consistent sizes ----------------------------------------
B = 8          # batch
F = 32         # x_features
M = 4          # mid_features
C = 4          # classnum
D = M * F      # mid_features * x_features = 128
NEG = -1e30    # additive mask sentinel (kept in f32 inside the kernel)


# ---- Pallas kernel ----------------------------------------------------------
def samn_kernel(x_ref, lblr_ref, lblc_ref, hs_ref,
                w1_ref, w2_ref, w34_ref, w5_ref, w78_ref, w9_ref,
                bias_ref, out_ref):
    f32 = jnp.float32
    bf16 = jnp.bfloat16

    def linear(v, w_ref, b):                 # bf16 MXU matmul, f32 accumulate
        return jnp.dot(v.astype(bf16), w_ref[...],
                       preferred_element_type=f32) + b

    # ---- per-class bookkeeping, built in-kernel from the labels -------------
    lbl_row = lblr_ref[...]                                    # (1, B) int32
    lbl_col = lblc_ref[...]                                    # (B, 1) int32
    cls = lax.broadcasted_iota(jnp.int32, (C, B), 0)           # row c = class id c
    onehot = (jnp.broadcast_to(lbl_row, (C, B)) == cls).astype(f32)   # (C, B)
    counts = jnp.sum(onehot, axis=1, keepdims=True)            # (C, 1)
    has = (counts > 0.0).astype(f32)                           # (C, 1)
    mean_w = onehot / jnp.maximum(counts, 1.0)                 # (C, B) per-class mean
    same = (jnp.broadcast_to(lbl_row, (B, B)) ==
            jnp.broadcast_to(lbl_col, (B, B)))                 # (B, B) same-label mask
    addmask = jnp.where(same, 0.0, NEG).astype(f32)            # (B, B) additive mask

    # ---- merged bias rows ----------------------------------------------------
    b1 = bias_ref[0:1, :F]
    b2 = bias_ref[1:2, :F]
    b34 = bias_ref[2:3, :]            # (1, 2D)
    b5 = bias_ref[3:4, :C]
    b78 = bias_ref[4:5, :D]
    b9 = bias_ref[5:6, :D]

    x = x_ref[...]                                             # (B, F) bf16

    h = jnp.maximum(linear(x, w1_ref, b1), 0.0)                # fc1 + relu
    h = jnp.maximum(linear(h, w2_ref, b2), 0.0)                # fc2 + relu

    # fused fc3 | fc4 : one (B,F)@(F,2D) matmul + one tanh, then lane split
    h34 = jnp.tanh(linear(h, w34_ref, b34))                    # (B, 2D)
    label_0 = h34[:, :D]                                       # (B, D) f32
    out = h34[:, D:]                                           # (B, D) f32

    # Gram matrix (explicit bf16 operands, f32 accumulate), contracted over last
    # dims of both operands -> no transposed operand materialized.
    l0_bf = label_0.astype(bf16)
    S = lax.dot_general(l0_bf, l0_bf, (((1,), (1,)), ((), ())),
                        preferred_element_type=f32)            # (B, B)

    # single masked row-softmax (mask stays f32 so -1e30 cannot overflow)
    S_m = S + addmask                                          # (B, B)
    e = jnp.exp(S_m - jnp.max(S_m, axis=-1, keepdims=True))    # (B, B)
    denom = jnp.sum(e, axis=-1, keepdims=True)                 # (B, 1), >= 1
    P = e * pl.reciprocal(denom, approx=True)                  # (B, B)

    # per-row aggregation then per-class mean: two small bf16 matmuls
    agg = jnp.dot(P.astype(bf16), l0_bf,
                  preferred_element_type=f32)                  # (B, D)
    lab_mean = jnp.dot(mean_w.astype(bf16), agg.astype(bf16),
                       preferred_element_type=f32)             # (C, D)

    # fused fc7 + fc8 : [lab_mean | hs] @ [w7 ; w8]  (K = 2D = 256)
    cat = jnp.concatenate([lab_mean, hs_ref[...]], axis=1)     # (C, 2D)
    hs_new = jax.nn.sigmoid(linear(cat, w78_ref, b78))         # (C, D)

    labels = jnp.tanh(linear(hs_new, w9_ref, b9)) * has        # fc9; empty class -> 0

    # cosine similarity: per-norm clamp at 1e-8 (matches torch eps), rsqrt on EUP
    sq_out = jnp.sum(out * out, axis=1, keepdims=True)         # (B, 1)
    sq_lab = jnp.sum(labels * labels, axis=1, keepdims=True)   # (C, 1)
    inv_out = lax.rsqrt(jnp.maximum(sq_out, 1e-16))
    inv_lab = lax.rsqrt(jnp.maximum(sq_lab, 1e-16))
    dots = lax.dot_general(out.astype(bf16),
                           (labels * inv_lab).astype(bf16),
                           (((1,), (1,)), ((), ())),
                           preferred_element_type=f32)         # (B, C)
    cos = dots * inv_out                                       # (B, C)

    ls = jnp.tanh(linear(labels, w5_ref, b5))                  # fc5, (C, C)

    # torch.cat([outs.transpose(1,0), ls], 0) -> (B + C, C); two direct stores,
    # no sublane concat/relayout.
    out_ref[:B, :] = cos
    out_ref[B:B + C, :] = ls


# ---- wrapper -----------------------------------------------------------------
def samn_forward(x, batch_label, params, hs0):
    (w1, b1, w2, b2, w3, b3, w4, b4, w5, b5, w7, b7, w8, b8, w9, b9) = params
    bf16 = jnp.bfloat16

    # fused weights: fc3|fc4 horizontally, fc7;fc8 vertically (bias pre-summed)
    w34 = jnp.concatenate([w3, w4], axis=1)                    # (F, 2D)
    b34 = jnp.concatenate([b3, b4])                            # (2D,)
    w78 = jnp.concatenate([w7, w8], axis=0)                    # (2D, D)
    b78 = b7 + b8                                              # (D,)

    # all biases merged into one (6, 2D) buffer -> one input DMA instead of six
    BW = 2 * D
    pad_row = lambda b: jnp.pad(b, (0, BW - b.shape[0])).reshape(1, BW)
    bias = jnp.concatenate([pad_row(b1), pad_row(b2), pad_row(b34),
                            pad_row(b5), pad_row(b78), pad_row(b9)], axis=0)

    lbl_row = batch_label.astype(jnp.int32).reshape(1, B)
    lbl_col = batch_label.astype(jnp.int32).reshape(B, 1)

    inputs = (
        x.astype(bf16), lbl_row, lbl_col, hs0,
        w1.astype(bf16), w2.astype(bf16), w34.astype(bf16),
        w5.astype(bf16), w78.astype(bf16), w9.astype(bf16),
        bias,
    )
    vmem_specs = [pl.BlockSpec(memory_space=pltpu.MemorySpace.VMEM)
                  for _ in inputs]
    # ~0.2 MB of operands total -> single invocation, whole-array VMEM residency.
    return pl.pallas_call(
        samn_kernel,
        out_shape=jax.ShapeDtypeStruct((B + C, C), jnp.float32),
        in_specs=vmem_specs,
        out_specs=pl.BlockSpec(memory_space=pltpu.MemorySpace.VMEM),
    )(*inputs)


# ---- deterministic parameter init (PyTorch nn.Linear style) -------------------
def init_linear(key, fan_in, fan_out):
    kw, kb = jax.random.split(key)
    bound = 1.0 / np.sqrt(fan_in)
    w = jax.random.uniform(kw, (fan_in, fan_out), jnp.float32, -bound, bound)  # (in, out)
    b = jax.random.uniform(kb, (fan_out,), jnp.float32, -bound, bound)
    return w, b


# ---- pure numpy reference (mirrors the torch forward literally) ---------------
def samn_reference(x, batch_label, p, hs0):
    (w1, b1, w2, b2, w3, b3, w4, b4, w5, b5, w7, b7, w8, b8, w9, b9) = p
    relu = lambda a: np.maximum(a, 0.0)
    sigmoid = lambda a: 1.0 / (1.0 + np.exp(-a))

    def softmax_rows(a):
        a = a - a.max(axis=1, keepdims=True)
        e = np.exp(a)
        return e / e.sum(axis=1, keepdims=True)

    h = relu(x @ w1 + b1)
    h = relu(h @ w2 + b2)
    label_0 = np.tanh(h @ w3 + b3)
    out = np.tanh(h @ w4 + b4)

    labels = [np.zeros(D, np.float32) for _ in range(C)]
    hs = [hs0[i].copy() for i in range(C)]
    outs = []
    for i in range(C):
        sel = label_0[batch_label == i]
        if len(sel) != 0:
            A = softmax_rows(sel @ sel.T)
            lab = (A @ sel).mean(axis=0)
            hsi = sigmoid(lab @ w7 + b7 + hs[i] @ w8 + b8)
            labels[i] = np.tanh(hsi @ w9 + b9)
        li = labels[i]
        dot = out @ li
        # torch.cosine_similarity clamps each norm at eps = 1e-8
        denom = (np.maximum(np.linalg.norm(out, axis=1), 1e-8)
                 * np.maximum(np.linalg.norm(li), 1e-8))
        outs.append(dot / denom)
    outs = np.stack(outs, 0)                 # (C, B)
    ls = np.stack(labels, 0)                 # (C, D)
    ls = np.tanh(ls @ w5 + b5)               # (C, C)
    return np.concatenate([outs.T, ls], axis=0)


# ---- main ---------------------------------------------------------------------
if __name__ == "__main__":
    key = jax.random.PRNGKey(0)
    keys = jax.random.split(key, 12)

    w1, b1 = init_linear(keys[0], F, F)          # fc1
    w2, b2 = init_linear(keys[1], F, F)          # fc2
    w3, b3 = init_linear(keys[2], F, D)          # fc3
    w4, b4 = init_linear(keys[3], F, D)          # fc4
    w5, b5 = init_linear(keys[4], D, C)          # fc5
    w7, b7 = init_linear(keys[5], D, D)          # fc7
    w8, b8 = init_linear(keys[6], D, D)          # fc8
    w9, b9 = init_linear(keys[7], D, D)          # fc9
    # TODO(synk): fc6, fc10, dropout, batchnorm, avg_pool, c1/c2 are defined in
    # __init__ but never used in forward(), so they are intentionally not implemented.
    # TODO(synk): the in-place self.hs / self.labels state updates are side effects of
    # the torch module; forward() only returns `out`, so the updated hs is not emitted.
    params = (w1, b1, w2, b2, w3, b3, w4, b4, w5, b5, w7, b7, w8, b8, w9, b9)

    hs0 = jax.random.uniform(keys[8], (C, D), jnp.float32)      # self.hs (torch.rand)
    x = jax.random.normal(keys[9], (B, F), jnp.float32)
    batch_label = jnp.array([0, 1, 2, 3, 0, 1, 2, 3], dtype=jnp.int32)

    fwd = jax.jit(samn_forward)
    result = jax.block_until_ready(fwd(x, batch_label, params, hs0))

    # cross-check against a literal numpy re-implementation of the torch forward
    np_params = tuple(np.asarray(a) for a in params)
    ref = samn_reference(np.asarray(x), np.asarray(batch_label), np_params,
                         np.asarray(hs0))
    np.testing.assert_allclose(np.asarray(result), ref, atol=5e-2, rtol=5e-2)

    print("KERNEL_OK")
</pallas_src>

<mosaic_0001>
module attributes {stable_mosaic.version = 11 : i64} {
  func.func @samn_kernel(%arg0: memref<8x32xbf16, #tpu.memory_space<vmem>>, %arg1: memref<1x8xi32, #tpu.memory_space<vmem>>, %arg2: memref<8x1xi32, #tpu.memory_space<vmem>>, %arg3: memref<4x128xf32, #tpu.memory_space<vmem>>, %arg4: memref<32x32xbf16, #tpu.memory_space<vmem>>, %arg5: memref<32x32xbf16, #tpu.memory_space<vmem>>, %arg6: memref<32x256xbf16, #tpu.memory_space<vmem>>, %arg7: memref<128x4xbf16, #tpu.memory_space<vmem>>, %arg8: memref<256x128xbf16, #tpu.memory_space<vmem>>, %arg9: memref<128x128xbf16, #tpu.memory_space<vmem>>, %arg10: memref<6x256xf32, #tpu.memory_space<vmem>>, %arg11: memref<12x4xf32, #tpu.memory_space<vmem>>) attributes {dimension_semantics = [], scalar_prefetch = 0 : i64, scratch_operands = 0 : i64, tpu.core_type = #tpu.core_type<tc>} {
    %c0 = arith.constant 0 : index
    %c0_0 = arith.constant 0 : index
    %0 = vector.load %arg1[%c0, %c0_0] : memref<1x8xi32, #tpu.memory_space<vmem>>, vector<1x8xi32>
    %c0_1 = arith.constant 0 : index
    %c0_2 = arith.constant 0 : index
    %1 = vector.load %arg2[%c0_1, %c0_2] : memref<8x1xi32, #tpu.memory_space<vmem>>, vector<8x1xi32>
    %2 = tpu.iota {dimensions = array<i32: 0>} : vector<4x8xi32>
    %3 = vector.shape_cast %0 : vector<1x8xi32> to vector<1x8xi32>
    %4 = vector.broadcast %3 : vector<1x8xi32> to vector<4x8xi32>
    %5 = arith.cmpi eq, %4, %2 : vector<4x8xi32>
    %6 = arith.extui %5 : vector<4x8xi1> to vector<4x8xi32>
    %7 = arith.sitofp %6 : vector<4x8xi32> to vector<4x8xf32>
    %cst = arith.constant dense<0.000000e+00> : vector<4xf32>
    %8 = vector.multi_reduction <add>, %7, %cst [1] : vector<4x8xf32> to vector<4xf32>
    %9 = vector.shape_cast %8 : vector<4xf32> to vector<4x1xf32>
    %cst_3 = arith.constant 0.000000e+00 : f32
    %10 = vector.broadcast %cst_3 : f32 to vector<4x1xf32>
    %11 = arith.cmpf ogt, %9, %10 : vector<4x1xf32>
    %12 = arith.extui %11 : vector<4x1xi1> to vector<4x1xi32>
    %13 = arith.sitofp %12 : vector<4x1xi32> to vector<4x1xf32>
    %cst_4 = arith.constant 1.000000e+00 : f32
    %14 = vector.broadcast %cst_4 : f32 to vector<4x1xf32>
    %15 = arith.maximumf %9, %14 : vector<4x1xf32>
    %16 = vector.broadcast %15 : vector<4x1xf32> to vector<4x8xf32>
    %17 = arith.divf %7, %16 : vector<4x8xf32>
    %18 = vector.shape_cast %0 : vector<1x8xi32> to vector<1x8xi32>
    %19 = vector.broadcast %18 : vector<1x8xi32> to vector<8x8xi32>
    %20 = vector.shape_cast %1 : vector<8x1xi32> to vector<8x1xi32>
    %21 = vector.broadcast %20 : vector<8x1xi32> to vector<8x8xi32>
    %22 = arith.cmpi eq, %19, %21 : vector<8x8xi32>
    %cst_5 = arith.constant 0.000000e+00 : f32
    %cst_6 = arith.constant -1.000000e+30 : f32
    %23 = vector.broadcast %cst_5 : f32 to vector<8x8xf32>
    %24 = vector.broadcast %cst_6 : f32 to vector<8x8xf32>
    %25 = arith.select %22, %23, %24 : vector<8x8xi1>, vector<8x8xf32>
    %c0_7 = arith.constant 0 : index
    %c0_8 = arith.constant 0 : index
    %26 = vector.load %arg10[%c0_7, %c0_8] : memref<6x256xf32, #tpu.memory_space<vmem>>, vector<1x32xf32>
    %c1 = arith.constant 1 : index
    %c0_9 = arith.constant 0 : index
    %27 = vector.load %arg10[%c1, %c0_9] : memref<6x256xf32, #tpu.memory_space<vmem>>, vector<1x32xf32>
    %c2 = arith.constant 2 : index
    %c0_10 = arith.constant 0 : index
    %28 = vector.load %arg10[%c2, %c0_10] : memref<6x256xf32, #tpu.memory_space<vmem>>, vector<1x256xf32>
    %c3 = arith.constant 3 : index
    %c0_11 = arith.constant 0 : index
    %29 = vector.load %arg10[%c3, %c0_11] : memref<6x256xf32, #tpu.memory_space<vmem>>, vector<1x4xf32>
    %c4 = arith.constant 4 : index
    %c0_12 = arith.constant 0 : index
    %30 = vector.load %arg10[%c4, %c0_12] : memref<6x256xf32, #tpu.memory_space<vmem>>, vector<1x128xf32>
    %c5 = arith.constant 5 : index
    %c0_13 = arith.constant 0 : index
    %31 = vector.load %arg10[%c5, %c0_13] : memref<6x256xf32, #tpu.memory_space<vmem>>, vector<1x128xf32>
    %c0_14 = arith.constant 0 : index
    %c0_15 = arith.constant 0 : index
    %32 = vector.load %arg0[%c0_14, %c0_15] : memref<8x32xbf16, #tpu.memory_space<vmem>>, vector<8x32xbf16>
    %c0_16 = arith.constant 0 : index
    %c0_17 = arith.constant 0 : index
    %33 = vector.load %arg4[%c0_16, %c0_17] : memref<32x32xbf16, #tpu.memory_space<vmem>>, vector<32x32xbf16>
    %cst_18 = arith.constant dense<0.000000e+00> : vector<8x32xf32>
    %34 = tpu.matmul %32, %33, %cst_18 {dimension_numbers = #tpu.dot_dimension_numbers<[1], [0], [0], [1], [0, 0, 1, 1], [], []>} : vector<8x32xbf16>, vector<32x32xbf16>, vector<8x32xf32> -> vector<8x32xf32>
    %35 = vector.broadcast %26 : vector<1x32xf32> to vector<8x32xf32>
    %36 = arith.addf %34, %35 : vector<8x32xf32>
    %cst_19 = arith.constant 0.000000e+00 : f32
    %37 = vector.broadcast %cst_19 : f32 to vector<8x32xf32>
    %38 = arith.maximumf %36, %37 : vector<8x32xf32>
    %39 = arith.truncf %38 : vector<8x32xf32> to vector<8x32xbf16>
    %c0_20 = arith.constant 0 : index
    %c0_21 = arith.constant 0 : index
    %40 = vector.load %arg5[%c0_20, %c0_21] : memref<32x32xbf16, #tpu.memory_space<vmem>>, vector<32x32xbf16>
    %cst_22 = arith.constant dense<0.000000e+00> : vector<8x32xf32>
    %41 = tpu.matmul %39, %40, %cst_22 {dimension_numbers = #tpu.dot_dimension_numbers<[1], [0], [0], [1], [0, 0, 1, 1], [], []>} : vector<8x32xbf16>, vector<32x32xbf16>, vector<8x32xf32> -> vector<8x32xf32>
    %42 = vector.broadcast %27 : vector<1x32xf32> to vector<8x32xf32>
    %43 = arith.addf %41, %42 : vector<8x32xf32>
    %cst_23 = arith.constant 0.000000e+00 : f32
    %44 = vector.broadcast %cst_23 : f32 to vector<8x32xf32>
    %45 = arith.maximumf %43, %44 : vector<8x32xf32>
    %46 = arith.truncf %45 : vector<8x32xf32> to vector<8x32xbf16>
    %c0_24 = arith.constant 0 : index
    %c0_25 = arith.constant 0 : index
    %47 = vector.load %arg6[%c0_24, %c0_25] : memref<32x256xbf16, #tpu.memory_space<vmem>>, vector<32x256xbf16>
    %cst_26 = arith.constant dense<0.000000e+00> : vector<8x256xf32>
    %48 = tpu.matmul %46, %47, %cst_26 {dimension_numbers = #tpu.dot_dimension_numbers<[1], [0], [0], [1], [0, 0, 1, 1], [], []>} : vector<8x32xbf16>, vector<32x256xbf16>, vector<8x256xf32> -> vector<8x256xf32>
    %49 = vector.broadcast %28 : vector<1x256xf32> to vector<8x256xf32>
    %50 = arith.addf %48, %49 : vector<8x256xf32>
    %51 = math.tanh %50 : vector<8x256xf32>
    %52 = vector.extract_strided_slice %51 {offsets = [0, 0], sizes = [8, 128], strides = [1, 1]} : vector<8x256xf32> to vector<8x128xf32>
    %53 = vector.extract_strided_slice %51 {offsets = [0, 128], sizes = [8, 128], strides = [1, 1]} : vector<8x256xf32> to vector<8x128xf32>
    %54 = arith.truncf %52 : vector<8x128xf32> to vector<8x128xbf16>
    %cst_27 = arith.constant dense<0.000000e+00> : vector<8x8xf32>
    %55 = tpu.matmul %54, %54, %cst_27 {dimension_numbers = #tpu.dot_dimension_numbers<[1], [1], [0], [0], [0, 0, 1, 0], [], []>} : vector<8x128xbf16>, vector<8x128xbf16>, vector<8x8xf32> -> vector<8x8xf32>
    %56 = arith.addf %55, %25 : vector<8x8xf32>
    %cst_28 = arith.constant dense<0xFF800000> : vector<8xf32>
    %57 = vector.multi_reduction <maximumf>, %56, %cst_28 [1] : vector<8x8xf32> to vector<8xf32>
    %58 = vector.shape_cast %57 : vector<8xf32> to vector<8x1xf32>
    %59 = vector.broadcast %58 : vector<8x1xf32> to vector<8x8xf32>
    %60 = arith.subf %56, %59 : vector<8x8xf32>
    %61 = math.exp %60 : vector<8x8xf32>
    %cst_29 = arith.constant dense<0.000000e+00> : vector<8xf32>
    %62 = vector.multi_reduction <add>, %61, %cst_29 [1] : vector<8x8xf32> to vector<8xf32>
    %63 = vector.shape_cast %62 : vector<8xf32> to vector<8x1xf32>
    %64 = tpu.reciprocal %63 {approx = true} : vector<8x1xf32> -> vector<8x1xf32>
    %65 = vector.broadcast %64 : vector<8x1xf32> to vector<8x8xf32>
    %66 = arith.mulf %61, %65 : vector<8x8xf32>
    %67 = arith.truncf %66 : vector<8x8xf32> to vector<8x8xbf16>
    %cst_30 = arith.constant dense<0.000000e+00> : vector<8x128xf32>
    %68 = tpu.matmul %67, %54, %cst_30 {dimension_numbers = #tpu.dot_dimension_numbers<[1], [0], [0], [1], [0, 0, 1, 1], [], []>} : vector<8x8xbf16>, vector<8x128xbf16>, vector<8x128xf32> -> vector<8x128xf32>
    %69 = arith.truncf %17 : vector<4x8xf32> to vector<4x8xbf16>
    %70 = arith.truncf %68 : vector<8x128xf32> to vector<8x128xbf16>
    %cst_31 = arith.constant dense<0.000000e+00> : vector<4x128xf32>
    %71 = tpu.matmul %69, %70, %cst_31 {dimension_numbers = #tpu.dot_dimension_numbers<[1], [0], [0], [1], [0, 0, 1, 1], [], []>} : vector<4x8xbf16>, vector<8x128xbf16>, vector<4x128xf32> -> vector<4x128xf32>
    %c0_32 = arith.constant 0 : index
    %c0_33 = arith.constant 0 : index
    %72 = vector.load %arg3[%c0_32, %c0_33] : memref<4x128xf32, #tpu.memory_space<vmem>>, vector<4x128xf32>
    %73 = tpu.concatenate %71, %72 in 1 : vector<4x128xf32>, vector<4x128xf32> -> vector<4x256xf32>
    %74 = arith.truncf %73 : vector<4x256xf32> to vector<4x256xbf16>
    %c0_34 = arith.constant 0 : index
    %c0_35 = arith.constant 0 : index
    %75 = vector.load %arg8[%c0_34, %c0_35] : memref<256x128xbf16, #tpu.memory_space<vmem>>, vector<256x128xbf16>
    %cst_36 = arith.constant dense<0.000000e+00> : vector<4x128xf32>
    %76 = tpu.matmul %74, %75, %cst_36 {dimension_numbers = #tpu.dot_dimension_numbers<[1], [0], [0], [1], [0, 0, 1, 1], [], []>} : vector<4x256xbf16>, vector<256x128xbf16>, vector<4x128xf32> -> vector<4x128xf32>
    %77 = vector.broadcast %30 : vector<1x128xf32> to vector<4x128xf32>
    %78 = arith.addf %76, %77 : vector<4x128xf32>
    %79 = arith.negf %78 : vector<4x128xf32>
    %80 = math.exp %79 : vector<4x128xf32>
    %cst_37 = arith.constant 1.000000e+00 : f32
    %81 = vector.broadcast %cst_37 : f32 to vector<4x128xf32>
    %82 = arith.addf %81, %80 : vector<4x128xf32>
    %83 = arith.divf %81, %82 : vector<4x128xf32>
    %84 = arith.truncf %83 : vector<4x128xf32> to vector<4x128xbf16>
    %c0_38 = arith.constant 0 : index
    %c0_39 = arith.constant 0 : index
    %85 = vector.load %arg9[%c0_38, %c0_39] : memref<128x128xbf16, #tpu.memory_space<vmem>>, vector<128x128xbf16>
    %cst_40 = arith.constant dense<0.000000e+00> : vector<4x128xf32>
    %86 = tpu.matmul %84, %85, %cst_40 {dimension_numbers = #tpu.dot_dimension_numbers<[1], [0], [0], [1], [0, 0, 1, 1], [], []>} : vector<4x128xbf16>, vector<128x128xbf16>, vector<4x128xf32> -> vector<4x128xf32>
    %87 = vector.broadcast %31 : vector<1x128xf32> to vector<4x128xf32>
    %88 = arith.addf %86, %87 : vector<4x128xf32>
    %89 = math.tanh %88 : vector<4x128xf32>
    %90 = vector.broadcast %13 : vector<4x1xf32> to vector<4x128xf32>
    %91 = arith.mulf %89, %90 : vector<4x128xf32>
    %92 = arith.mulf %53, %53 : vector<8x128xf32>
    %cst_41 = arith.constant dense<0.000000e+00> : vector<8xf32>
    %93 = vector.multi_reduction <add>, %92, %cst_41 [1] : vector<8x128xf32> to vector<8xf32>
    %94 = vector.shape_cast %93 : vector<8xf32> to vector<8x1xf32>
    %95 = arith.mulf %91, %91 : vector<4x128xf32>
    %cst_42 = arith.constant dense<0.000000e+00> : vector<4xf32>
    %96 = vector.multi_reduction <add>, %95, %cst_42 [1] : vector<4x128xf32> to vector<4xf32>
    %97 = vector.shape_cast %96 : vector<4xf32> to vector<4x1xf32>
    %cst_43 = arith.constant 1.000000e-16 : f32
    %98 = vector.broadcast %cst_43 : f32 to vector<8x1xf32>
    %99 = arith.maximumf %94, %98 : vector<8x1xf32>
    %100 = math.rsqrt %99 : vector<8x1xf32>
    %cst_44 = arith.constant 1.000000e-16 : f32
    %101 = vector.broadcast %cst_44 : f32 to vector<4x1xf32>
    %102 = arith.maximumf %97, %101 : vector<4x1xf32>
    %103 = math.rsqrt %102 : vector<4x1xf32>
    %104 = arith.truncf %53 : vector<8x128xf32> to vector<8x128xbf16>
    %105 = vector.broadcast %103 : vector<4x1xf32> to vector<4x128xf32>
    %106 = arith.mulf %91, %105 : vector<4x128xf32>
    %107 = arith.truncf %106 : vector<4x128xf32> to vector<4x128xbf16>
    %cst_45 = arith.constant dense<0.000000e+00> : vector<8x4xf32>
    %108 = tpu.matmul %104, %107, %cst_45 {dimension_numbers = #tpu.dot_dimension_numbers<[1], [1], [0], [0], [0, 0, 1, 0], [], []>} : vector<8x128xbf16>, vector<4x128xbf16>, vector<8x4xf32> -> vector<8x4xf32>
    %109 = vector.broadcast %100 : vector<8x1xf32> to vector<8x4xf32>
    %110 = arith.mulf %108, %109 : vector<8x4xf32>
    %111 = arith.truncf %91 : vector<4x128xf32> to vector<4x128xbf16>
    %c0_46 = arith.constant 0 : index
    %c0_47 = arith.constant 0 : index
    %112 = vector.load %arg7[%c0_46, %c0_47] : memref<128x4xbf16, #tpu.memory_space<vmem>>, vector<128x4xbf16>
    %cst_48 = arith.constant dense<0.000000e+00> : vector<4x4xf32>
    %113 = tpu.matmul %111, %112, %cst_48 {dimension_numbers = #tpu.dot_dimension_numbers<[1], [0], [0], [1], [0, 0, 1, 1], [], []>} : vector<4x128xbf16>, vector<128x4xbf16>, vector<4x4xf32> -> vector<4x4xf32>
    %114 = vector.broadcast %29 : vector<1x4xf32> to vector<4x4xf32>
    %115 = arith.addf %113, %114 : vector<4x4xf32>
    %116 = math.tanh %115 : vector<4x4xf32>
    %c0_49 = arith.constant 0 : index
    %c0_50 = arith.constant 0 : index
    %117 = vector.load %arg11[%c0_49, %c0_50] : memref<12x4xf32, #tpu.memory_space<vmem>>, vector<8x4xf32>
    tpu.vector_store %arg11[%c0_49, %c0_50], %110 {strides = array<i32>} : memref<12x4xf32, #tpu.memory_space<vmem>>, vector<8x4xf32>,
    %c8 = arith.constant 8 : index
    %c0_51 = arith.constant 0 : index
    %118 = vector.load %arg11[%c8, %c0_51] : memref<12x4xf32, #tpu.memory_space<vmem>>, vector<4x4xf32>
    tpu.vector_store %arg11[%c8, %c0_51], %116 {strides = array<i32>} : memref<12x4xf32, #tpu.memory_space<vmem>>, vector<4x4xf32>,
    return
  }
}

</mosaic_0001>

<bundles_post_ra>
// kernel: samn_forward.1
= control target key start
LH: loop header
LB: loop body
LE: loop exit
PB: predicated region body
PF: predicated region fallthrough
CT: control target
= control target key end

     0   :  { %v1132_v0 = vmov 0.0   ;;  %vm1133_vm0 = vmmov 0   ;;  %vm89_vm1 = vcmask 261120   ;;  %v1134_v18 = vmov 0   ;;  %s1420_s4 = inlined_call_operand.vmem [shape: bf16[32,32], index: 4, kind: input, shape index: {}]   ;;  %s1421_s0 = inlined_call_operand.vmem [shape: bf16[8,32], index: 0, kind: input, shape index: {}]   ;;  %s1422_s5 = inlined_call_operand.vmem [shape: bf16[32,32], index: 5, kind: input, shape index: {}]   ;;  %s1423_s6 = inlined_call_operand.vmem [shape: bf16[32,256], index: 6, kind: input, shape index: {}]   ;;  %s1424_s10 = inlined_call_operand.vmem [shape: f32[6,256], index: 10, kind: input, shape index: {}]   ;;  %s1425_s2 = inlined_call_operand.vmem [shape: s32[8,1], index: 2, kind: input, shape index: {}]   ;;  %s1426_s1 = inlined_call_operand.vmem [shape: s32[1,8], index: 1, kind: input, shape index: {}]   ;;  %s1427_s8 = inlined_call_operand.vmem [shape: bf16[256,128], index: 8, kind: input, shape index: {}]   ;;  %s1428_s3 = inlined_call_operand.vmem [shape: f32[4,128], index: 3, kind: input, shape index: {}]   ;;  %s1429_s9 = inlined_call_operand.vmem [shape: bf16[128,128], index: 9, kind: input, shape index: {}]   ;;  %s1430_s7 = inlined_call_operand.vmem [shape: bf16[128,4], index: 7, kind: input, shape index: {}]   ;;  %s1431_s11 = inlined_call_operand.vmem [shape: f32[12,4], index: 11, kind: output, shape index: {}]  }
   0x1   :  { %983 = vmatprep.subr.bf16.mxu0 %v1132_v0  ;;  %v1068_v1 = vld [vmem:[%s1420_s4] sm:$0xff]   ;;  %987 = vmatprep.mubr.msk.bf16.mxu0 %vm1133_vm0, %v1132_v0  ;;  %v1069_v2 = vld [vmem:[%s1420_s4 + $0x8] sm:$0xff]   ;;  %v1077_v16 = vld [vmem:[%s1423_s6 + $0x14] ss:$8 sps:$4 sm:$0xff]   ;;  %v41_v28 = vlaneseq  ;;  %vm334_vm2 = vcmask 1043456   ;;  %vm318_vm4 = vcmask 64512  }
   0x2   :  { %999 = vmatprep.subr.bf16.mxu1 %v1132_v0  ;;  %1001 = vmatprep.mubr.msk.bf16.mxu1 %vm1133_vm0, %v1132_v0  ;;  %v72_v3 = vld [vmem:[%s1421_s0] sm:$0xf]  ;;  %v1071_v5 = vld [vmem:[%s1422_s5 + $0x8] sm:$0xff]   ;;  %v1075_v17 = vld [vmem:[%s1423_s6 + $0x10] ss:$8 sps:$4 sm:$0xff]   ;;  %vm50_vm6 = vcmask 60416  }
   0x3   :  { %984 = vmatpush3.bf16.msra.mxu0 %v1068_v1  ;;  %v1070_v4 = vld [vmem:[%s1422_s5] sm:$0xff]   ;;  %1067 = vset.pattern.permute.xlu0 %v1134_v18  ;;  %v1249_v29 = vshrl.u32 %v41_v28, 7  ;;  %v1135_v43 = vmov -1e+30   ;;  %v1080_v1 = vld [vmem:[%s1427_s8 + $0x48] sm:$0xff]   ;;  %vm873_vm8 = vcmask 27648  }
   0x4   :  { %985 = vmatprep.subr.bf16.mxu0 %v1132_v0  ;;  %v1074_v6 = vld [vmem:[%s1423_s6 + $0x4] ss:$8 sps:$4 sm:$0xff]   ;;  %v65_v7 = vld [vmem:[%s1424_s10] ss:$0 sm:$0xff]  ;;  %v66_v19 = vld [vmem:[%s1424_s10 + $0x1] ss:$0 sm:$0xff] }
   0x5   :  { %v1072_v14 = vld [vmem:[%s1423_s6] ss:$8 sps:$4 sm:$0xff]   ;;  %v203_v30 = vsub.s32 0, %v1249_v29  ;;  %vm871_vm9 = vcmask 31744  }
   0x6   :  { %v40_v27 = vld [vmem:[%s1425_s2] sm:$0xff] }
   0x7   :  { %986 = vmatpush3.bf16.msra.mxu0 %v1069_v2  ;;  %61 = vperm.xlu0 %1067, %v40_v27   ;;  %v1255_v31 = vld [vmem:[%s1424_s10 + $0x2] ss:$8 sm:$0x3]  ;;  %v879_v42 = vld [vmem:[%s1426_s1] ss:$0 sm:$0xff] }
   0x8   :  { %991 = vmatprep.subr.bf16.mxu0 %v1132_v0  ;;  %v204_v32 = vrot.slane %v1255_v31, %v203_v30  ;;  %vm47_vm5 = vcmp.eq.s32.totalorder %v879_v42, %v1249_v29  ;;  %v1078_v62 = vld [vmem:[%s1427_s8 + $0x40] sm:$0xff]   ;;  %v1081_v2 = vld [vmem:[%s1427_s8 + $0x8] sm:$0xff]  }
   0x9   :  { %v880_v56 = vsel %vm47_vm5, 1.0, %v1132_v0  ;;  %v1079_v63 = vld [vmem:[%s1427_s8] sm:$0xff]  }
   0xa   :  { %988 = vmatmul.mubr.msk.bf16.vlgmr.msra.gmra.mrb[0].mxu0 %vm89_vm1, %v72_v3  ;;  %v51_v57 = vsel %vm50_vm6, %v880_v56, 0.0  ;;  %v1082_v3 = vld [vmem:[%s1427_s8 + $0x50] sm:$0xff]  }
   0xb   :  { %995 = vmatprep.mubr.msk.bf16.mxu0 %vm1133_vm0, %v1132_v0  ;;  %992 = vmatpush3.bf16.msra.mxu0 %v1070_v4  ;;  %v1083_v4 = vld [vmem:[%s1427_s8 + $0x10] sm:$0xff]  }
   0xc   :  { %993 = vmatprep.subr.bf16.mxu0 %v1132_v0 }
   0xf   :  { %994 = vmatpush3.bf16.msra.mxu0 %v1071_v5  ;;  %v1084_v5 = vld [vmem:[%s1427_s8 + $0x58] sm:$0xff]  }
  0x10   :  { %234 = vmatprep.subr.bf16.mxu0 %v1074_v6  ;;  %v1085_v6 = vld [vmem:[%s1427_s8 + $0x18] sm:$0xff]  }
  0x86   :  { %v62_v41 = vpop.permute.xlu0 %61 }
  0x87   :  { %vm63_vm3 = vcmp.eq.s32.totalorder %v879_v42, %v62_v41  ;;  %v1099_v41 = vld [vmem:[%s1429_s9 + $0x28] sm:$0xff]   ;;  %v1100_v42 = vld [vmem:[%s1429_s9 + $0x30] sm:$0xff]  }
  0x88   :  { %v64_v44 = vsel %vm63_vm3, 0.0, %v1135_v43  ;;  %v1101_v43 = vld [vmem:[%s1429_s9 + $0x38] sm:$0xff]  }
  0xdd   :  { %v127_v8 = vpop.f32.mrb[0].mxu0 }
  0xde   :  { %v128_v9 = vadd.f32 %v127_v8, %v65_v7  ;;  %v989_v10 = vpop.f32.mrb[1].mxu0  ;;  %v1086_v7 = vld [vmem:[%s1427_s8 + $0x60] sm:$0xff]  }
  0xdf   :  { %v130_v11 = vpop.f32.mrb[2].mxu0  ;;  %v1087_v8 = vld [vmem:[%s1427_s8 + $0x20] sm:$0xff]   ;;  %v1089_v10 = vld [vmem:[%s1427_s8 + $0x28] sm:$0xff]  }
  0xe0   :  { %v133_v12 = vmax.f32 %v128_v9, 0.0  ;;  %v990_v13 = vpop.f32.mrb[3].mxu0  ;;  %v1088_v9 = vld [vmem:[%s1427_s8 + $0x68] sm:$0xff]   ;;  %v1090_v11 = vld [vmem:[%s1427_s8 + $0x70] sm:$0xff]  }
  0xe1   :  { %v1092_v13 = vld [vmem:[%s1427_s8 + $0x78] sm:$0xff]  }
  0xe2   :  { %v134_v15 = vpack.c.bf16 %v133_v12, %v133_v12  ;;  %v1091_v12 = vld [vmem:[%s1427_s8 + $0x30] sm:$0xff]  }
  0xe4   :  { %996 = vmatmul.mubr.msk.bf16.vlgmr.msra.gmra.mrb[4].mxu0 %vm89_vm1, %v134_v15 }
  0xe5   :  { %235 = vmatpush1.bf16.msra.mxu0 %v1072_v14  ;;  %266 = vmatprep.mubr.bf16.mxu0 %v1134_v18 }
  0xe6   :  { %236 = vmatprep.subr.bf16.mxu0 %v1077_v16 }
  0xe9   :  { %237 = vmatpush1.bf16.msra.mxu0 %v1075_v17 }
  0xea   :  { %1005 = vmatprep.subr.bf16.mxu0 %v1132_v0 }
 0x1b7   :  { %v188_v20 = vpop.f32.mrb[4].mxu0 }
 0x1b8   :  { %v189_v21 = vadd.f32 %v188_v20, %v66_v19  ;;  %v997_v22 = vpop.f32.mrb[5].mxu0 }
 0x1b9   :  { %v191_v23 = vpop.f32.mrb[6].mxu0 }
 0x1ba   :  { %v194_v24 = vmax.f32 %v189_v21, 0.0  ;;  %v998_v25 = vpop.f32.mrb[7].mxu0 }
 0x1bb   :  { %v1093_v25 = vld [vmem:[%s1427_s8 + $0x38] sm:$0xff]  }
 0x1bc   :  { %v195_v26 = vpack.c.bf16 %v194_v24, %v194_v24 }
 0x1be   :  { %893 = vmatmul.mubr.msk.bf16.vlgmr.msra.gmra.mrb[8].mxu0 %vm89_vm1, %v195_v26  ;;  %v426_v26 = vld [vmem:[%s1428_s3] sm:$0xf] }
 0x1bf   :  { %1007 = vmatprep.mubr.msk.bf16.mxu0 %vm1133_vm0, %v1132_v0  ;;  %v428_v27 = vpack.c.bf16 %v426_v26, %v426_v26 }
 0x291   :  { %v268_v33 = vpop.f32.mrb[8].mxu0 }
 0x292   :  { %v269_v34 = vadd.f32 %v268_v33, %v204_v32  ;;  %v1258_v35 = vpop.f32.mrb[9].mxu0 }
 0x293   :  { %v272_v36 = vpop.f32.mrb[10].mxu0 }
 0x294   :  { %1110 = vtanh.f32 %v269_v34  ;;  %v273_v37 = vpop.f32.mrb[11].mxu0  ;;  %v1094_v36 = vld [vmem:[%s1429_s9] sm:$0xff]  }
 0x295   :  { %v1095_v37 = vld [vmem:[%s1429_s9 + $0x8] sm:$0xff]  }
 0x29e   :  { %v1111_v38 = vpop.eup %1110 }
 0x29f   :  { %v277_v39 = vpack.c.bf16 %v1111_v38, %v1111_v38  ;;  %v1096_v38 = vld [vmem:[%s1429_s9 + $0x10] sm:$0xff]  }
 0x2a1   :  { %1000 = vmatpush3.bf16.xpose.msra.mxu1 %v277_v39  ;;  %v336_v40 = vsel %vm334_vm2, %v277_v39, 0 }
 0x2a2   :  { %1006 = vmatpush3.bf16.msra.mxu0 %v336_v40  ;;  %1011 = vmatprep.subr.bf16.mxu1 %v1132_v0  ;;  %v1098_v40 = vld [vmem:[%s1429_s9 + $0x20] sm:$0xff]  }
 0x2a3   :  { %941 = vmatprep.subr.bf16.mxu0 %v1078_v62  ;;  %v1108_v62 = vld [vmem:[%s1430_s7 + $0x30] sm:$0xff]  }
 0x2a8   :  { %1002 = vmatmul.mubr.bf16.vlgmr.msra.gmra.mrb[0].mxu1 %v277_v39  ;;  %v1097_v39 = vld [vmem:[%s1429_s9 + $0x18] sm:$0xff]  }
 0x2a9   :  { %1013 = vmatprep.mubr.msk.bf16.mxu1 %vm1133_vm0, %v1132_v0 }
 0x37b   :  { %v312_v45 = vpop.f32.mrb[0].mxu1 }
 0x37c   :  { %v313_v46 = vadd.f32 %v312_v45, %v64_v44  ;;  %v1003_v47 = vpop.f32.mrb[1].mxu1  ;;  %v70_v45 = vld [vmem:[%s1424_s10 + $0x4] ss:$0 sm:$0xff] }
 0x37d   :  { %v315_v48 = vpop.f32.mrb[2].mxu1 }
 0x37e   :  { %v1004_v49 = vpop.f32.mrb[3].mxu1  ;;  %v319_v50 = vsel %vm318_vm4, %v313_v46, -inf }
 0x37f   :  { %320 = vmax.xlane.f32.xlu0 %v319_v50 }
 0x40c   :  { %v321_v51 = vpop.xlane.xlu0 %320 }
 0x40d   :  { %v322_v52 = vsub.f32 %v313_v46, %v321_v51 }
 0x40f   :  { %v323_v53 = vmul.f32 1.442695, %v322_v52 }
 0x411   :  { %1112 = vpow2.f32 %v323_v53 }
 0x41b   :  { %v1113_v54 = vpop.eup %1112 }
 0x41c   :  { %v325_v55 = vsel %vm318_vm4, %v1113_v54, 0.0 }
 0x41d   :  { %326 = vadd.xlane.f32.xlu1 %v325_v55  ;;  %v1102_v55 = vld [vmem:[%s1430_s7] sm:$0xff]  }
 0x421   :  { %52 = vadd.xlane.f32.xlu1 %v51_v57  ;;  %v1103_v57 = vld [vmem:[%s1430_s7 + $0x8] sm:$0xff]  }
 0x4aa   :  { %v327_v58 = vpop.xlane.xlu1 %326 }
 0x4ab   :  { %1114 = vrcp.f32 %v327_v58  ;;  %v1104_v58 = vld [vmem:[%s1430_s7 + $0x10] sm:$0xff]  }
 0x4ae   :  { %v1317_v14 = vpop.xlane.xlu1 %52 }
 0x4af   :  { %v57_v15 = vmax.f32 %v1317_v14, 1.0  ;;  %vm54_vm7 = vcmp.gt.f32.partialorder %v1317_v14, 0.0 }
 0x4b1   :  { %1116 = vrcp.f32 %v57_v15 }
 0x4b5   :  { %v1115_v59 = vpop.eup %1114 }
 0x4b6   :  { %v329_v60 = vmul.f32 %v1115_v59, %v1113_v54  ;;  %v1105_v59 = vld [vmem:[%s1430_s7 + $0x18] sm:$0xff]  }
 0x4b8   :  { %v330_v61 = vpack.c.bf16 %v329_v60, %v329_v60  ;;  %v1106_v60 = vld [vmem:[%s1430_s7 + $0x20] sm:$0xff]  }
 0x4ba   :  { %1008 = vmatmul.mubr.msk.bf16.vlgmr.msra.gmra.mrb[12].mxu0 %vm318_vm4, %v330_v61  ;;  %v1107_v61 = vld [vmem:[%s1430_s7 + $0x28] sm:$0xff]  }
 0x4bb   :  { %942 = vmatpush3.bf16.msra.mxu0 %v1079_v63  ;;  %v1117_v16 = vpop.eup %1116  ;;  %589 = vmatprep.mubr.bf16.mxu0 %v428_v27  ;;  %v1109_v63 = vld [vmem:[%s1430_s7 + $0x38] sm:$0xff]  }
 0x4bc   :  { %943 = vmatprep.subr.bf16.mxu0 %v1080_v1  ;;  %v59_v17 = vmul.f32 %v1117_v16, %v880_v56  ;;  %v207_v1 = vsub.s32 1, %v1249_v29  ;;  %v881_v29 = vsel %vm54_vm7, 1.0, %v1132_v0 }
 0x4be   :  { %v378_v24 = vpack.c.bf16 %v59_v17, %v59_v17 }
 0x4bf   :  { %944 = vmatpush3.bf16.msra.mxu0 %v1081_v2  ;;  %v71_v2 = vld [vmem:[%s1424_s10 + $0x5] ss:$0 sm:$0xff] }
 0x4c0   :  { %945 = vmatprep.subr.bf16.mxu0 %v1082_v3  ;;  %v208_v3 = vrot.slane %v1255_v31, %v207_v1 }
 0x4c3   :  { %946 = vmatpush3.bf16.msra.mxu0 %v1083_v4 }
 0x4c4   :  { %947 = vmatprep.subr.bf16.mxu0 %v1084_v5 }
 0x4c7   :  { %948 = vmatpush3.bf16.msra.mxu0 %v1085_v6 }
 0x4c8   :  { %949 = vmatprep.subr.bf16.mxu0 %v1086_v7 }
 0x4cb   :  { %950 = vmatpush3.bf16.msra.mxu0 %v1087_v8 }
 0x4cc   :  { %951 = vmatprep.subr.bf16.mxu0 %v1088_v9  ;;  %v271_v9 = vadd.f32 %v1258_v35, %v208_v3 }
 0x4cf   :  { %952 = vmatpush3.bf16.msra.mxu0 %v1089_v10 }
 0x4d0   :  { %953 = vmatprep.subr.bf16.mxu0 %v1090_v11 }
 0x4d3   :  { %954 = vmatpush3.bf16.msra.mxu0 %v1091_v12 }
 0x4d4   :  { %955 = vmatprep.subr.bf16.mxu0 %v1092_v13 }
 0x4d7   :  { %956 = vmatpush3.bf16.msra.mxu0 %v1093_v25 }
 0x4d8   :  { %1037 = vmatprep.subr.bf16.mxu0 %v1132_v0 }
 0x58d   :  { %v372_v18 = vpop.f32.mrb[12].mxu0 }
 0x58e   :  { %v379_v19 = vpack.c.bf16 %v372_v18, %v372_v18  ;;  %v1009_v20 = vpop.f32.mrb[13].mxu0 }
 0x58f   :  { %v375_v21 = vpop.f32.mrb[14].mxu0 }
 0x590   :  { %v384_v22 = vsel %vm334_vm2, %v379_v19, 0  ;;  %v1010_v23 = vpop.f32.mrb[15].mxu0 }
 0x591   :  { %1012 = vmatpush3.bf16.msra.mxu1 %v384_v22 }
 0x592   :  { %1017 = vmatprep.subr.bf16.mxu1 %v1132_v0 }
 0x594   :  { %1014 = vmatmul.mubr.msk.bf16.vlgmr.msra.gmra.mrb[4].mxu1 %vm318_vm4, %v378_v24 }
 0x595   :  { %1033 = vmatprep.mubr.msk.bf16.mxu1 %vm1133_vm0, %v1132_v0  ;;  %1018 = vmatpush3.bf16.msra.mxu1 %v1094_v36 }
 0x596   :  { %1019 = vmatprep.subr.bf16.mxu1 %v1132_v0 }
 0x599   :  { %1020 = vmatpush3.bf16.msra.mxu1 %v1095_v37 }
 0x59a   :  { %1021 = vmatprep.subr.bf16.mxu1 %v1132_v0 }
 0x59d   :  { %1022 = vmatpush3.bf16.msra.mxu1 %v1096_v38 }
 0x59e   :  { %1023 = vmatprep.subr.bf16.mxu1 %v1132_v0 }
 0x5a1   :  { %1024 = vmatpush3.bf16.msra.mxu1 %v1097_v39 }
 0x5a2   :  { %1025 = vmatprep.subr.bf16.mxu1 %v1132_v0 }
 0x5a5   :  { %1026 = vmatpush3.bf16.msra.mxu1 %v1098_v40 }
 0x5a6   :  { %1027 = vmatprep.subr.bf16.mxu1 %v1132_v0 }
 0x5a9   :  { %1028 = vmatpush3.bf16.msra.mxu1 %v1099_v41 }
 0x5aa   :  { %1029 = vmatprep.subr.bf16.mxu1 %v1132_v0 }
 0x5ad   :  { %1030 = vmatpush3.bf16.msra.mxu1 %v1100_v42 }
 0x5ae   :  { %1031 = vmatprep.subr.bf16.mxu1 %v1132_v0 }
 0x5b1   :  { %1032 = vmatpush3.bf16.msra.mxu1 %v1101_v43 }
 0x5b2   :  { %1043 = vmatprep.subr.bf16.mxu1 %v1132_v0 }
 0x667   :  { %v420_v28 = vpop.f32.mrb[4].mxu1 }
 0x668   :  { %v427_v30 = vpack.c.bf16 %v420_v28, %v420_v28  ;;  %v1015_v32 = vpop.f32.mrb[5].mxu1 }
 0x669   :  { %v423_v33 = vpop.f32.mrb[6].mxu1 }
 0x66a   :  { %590 = vmatmul.mubr.bf16.vlgmr.msra.gmra.mrb[16].mxu0 %v427_v30  ;;  %v1016_v34 = vpop.f32.mrb[7].mxu1 }
 0x66b   :  { %1039 = vmatprep.mubr.msk.bf16.mxu0 %vm1133_vm0, %v1132_v0 }
 0x73d   :  { %v957_v44 = vpop.f32.mrb[16].mxu0 }
 0x73e   :  { %v958_v46 = vpop.f32.mrb[17].mxu0 }
 0x73f   :  { %v959_v47 = vadd.f32 %v958_v46, %v957_v44  ;;  %v960_v48 = vpop.f32.mrb[18].mxu0 }
 0x740   :  { %v961_v49 = vpop.f32.mrb[19].mxu0 }
 0x741   :  { %v592_v50 = vadd.f32 %v959_v47, %v70_v45 }
 0x743   :  { %v912_v51 = vmul.f32 -1.442695, %v592_v50 }
 0x745   :  { %1118 = vpow2.f32 %v912_v51 }
 0x74f   :  { %v1119_v52 = vpop.eup %1118 }
 0x750   :  { %v600_v53 = vadd.f32 1.0, %v1119_v52 }
 0x752   :  { %1120 = vrcp.f32 %v600_v53 }
 0x75c   :  { %v1121_v54 = vpop.eup %1120 }
 0x75d   :  { %v603_v56 = vpack.c.bf16 %v1121_v54, %v1121_v54 }
 0x75f   :  { %1034 = vmatmul.mubr.bf16.vlgmr.msra.gmra.mrb[8].mxu1 %v603_v56 }
 0x760   :  { %1044 = vmatpush3.bf16.msra.mxu1 %v1102_v55  ;;  %1059 = vmatprep.mubr.msk.bf16.mxu1 %vm1133_vm0, %v1132_v0 }
 0x761   :  { %1045 = vmatprep.subr.bf16.mxu1 %v1132_v0 }
 0x764   :  { %1046 = vmatpush3.bf16.msra.mxu1 %v1103_v57 }
 0x765   :  { %1047 = vmatprep.subr.bf16.mxu1 %v1132_v0 }
 0x768   :  { %1048 = vmatpush3.bf16.msra.mxu1 %v1104_v58 }
 0x769   :  { %1049 = vmatprep.subr.bf16.mxu1 %v1132_v0 }
 0x76c   :  { %1050 = vmatpush3.bf16.msra.mxu1 %v1105_v59 }
 0x76d   :  { %1051 = vmatprep.subr.bf16.mxu1 %v1132_v0 }
 0x770   :  { %1052 = vmatpush3.bf16.msra.mxu1 %v1106_v60 }
 0x771   :  { %1053 = vmatprep.subr.bf16.mxu1 %v1132_v0 }
 0x774   :  { %1054 = vmatpush3.bf16.msra.mxu1 %v1107_v61 }
 0x775   :  { %1055 = vmatprep.subr.bf16.mxu1 %v1132_v0 }
 0x778   :  { %1056 = vmatpush3.bf16.msra.mxu1 %v1108_v62 }
 0x779   :  { %1057 = vmatprep.subr.bf16.mxu1 %v1132_v0  ;;  %v69_v0 = vld [vmem:[%s1424_s10 + $0x3] ss:$0 sm:$0xff] }
 0x77c   :  { %1058 = vmatpush3.bf16.msra.mxu1 %v1109_v63 }
 0x832   :  { %v702_v4 = vpop.f32.mrb[8].mxu1 }
 0x833   :  { %v703_v5 = vadd.f32 %v702_v4, %v71_v2  ;;  %v1035_v6 = vpop.f32.mrb[9].mxu1 }
 0x834   :  { %v705_v7 = vpop.f32.mrb[10].mxu1 }
 0x835   :  { %1122 = vtanh.f32 %v703_v5  ;;  %v1036_v8 = vpop.f32.mrb[11].mxu1 }
 0x836   :  { %1124 = vtanh.f32 %v271_v9 }
 0x83f   :  { %v1123_v10 = vpop.eup %1122 }
 0x840   :  { %v709_v11 = vmul.f32 %v1123_v10, %v881_v29  ;;  %v1125_v15 = vpop.eup %1124 }
 0x841   :  { %v710_v16 = vmul.f32 %v1125_v15, %v1125_v15  ;;  %v721_v14 = vpack.c.bf16 %v1125_v15, %v1125_v15 }
 0x842   :  { %v765_v12 = vpack.c.bf16 %v709_v11, %v709_v11  ;;  %v713_v13 = vmul.f32 %v709_v11, %v709_v11 }
 0x844   :  { %1060 = vmatmul.mubr.bf16.vlgmr.msra.gmra.mrb[12].mxu1 %v765_v12  ;;  %v714_v31 = vsel %vm334_vm2, %v713_v13, 0.0 }
 0x845   :  { %715 = vadd.xlane.f32.xlu1 %v714_v31 }
 0x849   :  { %711 = vadd.xlane.f32.xlu1 %v710_v16 }
 0x8d2   :  { %v716_v17 = vpop.xlane.xlu1 %715 }
 0x8d3   :  { %v719_v18 = vmax.f32 %v716_v17, 1e-16 }
 0x8d5   :  { %1126 = vrsqrt.f32 %v719_v18 }
 0x8d6   :  { %v712_v27 = vpop.xlane.xlu1 %711 }
 0x8d7   :  { %v717_v28 = vmax.f32 %v712_v27, 1e-16 }
 0x8df   :  { %v1127_v35 = vpop.eup %1126 }
 0x8e0   :  { %v722_v19 = vmul.f32 %v1127_v35, %v709_v11 }
 0x8e2   :  { %v723_v20 = vpack.c.bf16 %v722_v19, %v722_v19 }
 0x8e4   :  { %1038 = vmatpush3.bf16.xpose.msra.mxu0 %v723_v20 }
 0x8eb   :  { %1040 = vmatmul.mubr.bf16.vlgmr.msra.gmra.mrb[20].mxu0 %v721_v14 }
 0x917   :  { %v864_v21 = vpop.f32.mrb[12].mxu1 }
 0x918   :  { %v865_v22 = vadd.f32 %v864_v21, %v69_v0  ;;  %v1061_v23 = vpop.f32.mrb[13].mxu1 }
 0x919   :  { %v867_v24 = vpop.f32.mrb[14].mxu1 }
 0x91a   :  { %1128 = vtanh.f32 %v865_v22  ;;  %v1062_v25 = vpop.f32.mrb[15].mxu1 }
 0x91b   :  { %1130 = vrsqrt.f32 %v717_v28 }
 0x924   :  { %v1129_v26 = vpop.eup %1128 }
 0x925   :  { %874 = vst.msk [vmem:[%s1431_s11 + $0x8] sm:$0xf] %vm873_vm8, %v1129_v26  ;;  %v1131_v30 = vpop.eup %1130 }
 0x9be   :  { %v758_v32 = vpop.f32.mrb[20].mxu0 }
 0x9bf   :  { %v764_v33 = vmul.f32 %v1131_v30, %v758_v32  ;;  %v1041_v34 = vpop.f32.mrb[21].mxu0 }
 0x9c0   :  { %v761_v36 = vpop.f32.mrb[22].mxu0 }
 0x9c1   :  { %872 = vst.msk [vmem:[%s1431_s11] sm:$0xff] %vm871_vm9, %v764_v33  ;;  %v1042_v37 = vpop.f32.mrb[23].mxu0 }

</bundles_post_ra>
